<compile_context>
chip_gen: v7x
topology: tpu7x:2x2x1
jax: 0.10.0
libtpu: 0.0.40
codegen_flags: <defaults>
</compile_context>

<pallas_src>
import functools

import jax
import jax.numpy as jnp
import numpy as np
from jax.experimental import pallas as pl
from jax.experimental.pallas import tpu as pltpu


# ---------------------------------------------------------------------------
# Pallas kernel
# ---------------------------------------------------------------------------
def condsim_kernel(
    img_ref,      # (tb*C, hw_tile)   streamed image tile (f32 or bf16)
    cat_ref,      # (tb, 2*num_cate)  f32
    sel_ref,      # (tb, tb*C)        f32  constant: row -> batch selector
    fold_ref,     # (tb*C, C)         f32  constant: row -> channel selector
    wtrk_ref,     # (C, Fp)           f32  trunk weight (un-tiled)
    btrk_ref,     # (1, Fp)           f32
    wfc_ref,      # (Fp, Ep)          f32  replaced backbone.fc
    bfc_ref,      # (1, Ep)           f32
    w1_ref,       # (2*num_cate, NC)  f32  cate_net Linear 1
    b1_ref,       # (1, NC)           f32
    w2_ref,       # (NC, NC)          f32  cate_net Linear 2
    b2_ref,       # (1, NC)           f32
    masks_ref,    # (NC, Ep)          f32  condition masks (Embedding weight)
    out_ref,      # (tb, Ep)          f32  final_feature (padded)
    acc_ref,      # scratch (tb*C, 1) f32  pooling accumulator (lane-reduced)
    *,
    inv_hw,
):
    hw = pl.program_id(1)

    # ----- init accumulator at the start of each batch tile -----
    @pl.when(hw == 0)
    def _init():
        acc_ref[...] = jnp.zeros_like(acc_ref)

    # ----- streamed partial sums for the global average pool -----
    # Lane-reduce the whole tile on the XLU: accumulator stays (tb*C, 1)
    # regardless of hw_tile, so VMEM does not grow with the stream block.
    acc_ref[...] += jnp.sum(img_ref[...].astype(jnp.float32),
                            axis=-1, keepdims=True)

    # ----- finalize once per batch tile -----
    @pl.when(hw == pl.num_programs(1) - 1)
    def _finalize():
        rowsum = acc_ref[...]                                        # (tb*C, 1)

        # fold (tb*C) row sums into a (tb, C) pooled matrix with two tiny
        # selector matmuls (no in-kernel reshape, no (tb*C, Fp) temporary):
        #   pooled[b, c] = rowsum[b*C + c] / HW
        pooled = jnp.dot(sel_ref[...], rowsum * fold_ref[...],
                         preferred_element_type=jnp.float32) * inv_hw  # (tb, C)

        trunk = jnp.dot(pooled, wtrk_ref[...],
                        preferred_element_type=jnp.float32) + btrk_ref[...]
        trunk = jnp.maximum(trunk, 0.0)                              # (tb, Fp)

        feat = jnp.dot(trunk, wfc_ref[...],
                       preferred_element_type=jnp.float32) + bfc_ref[...]  # (tb, Ep)

        # cate_net: Linear -> ReLU -> Linear -> Softmax(dim=1)
        # (tiny K/N: accepted padded-MXU overhead, runs once per batch tile)
        h = jnp.dot(cat_ref[...], w1_ref[...],
                    preferred_element_type=jnp.float32) + b1_ref[...]
        h = jnp.maximum(h, 0.0)                                      # (tb, NC)
        logits = jnp.dot(h, w2_ref[...],
                         preferred_element_type=jnp.float32) + b2_ref[...]
        m = jnp.max(logits, axis=-1, keepdims=True)
        e = jnp.exp(logits - m)
        attn = e / jnp.sum(e, axis=-1, keepdims=True)                # exact softmax

        # final[b,d] = sum_c masks[c,d] * feat[b,d] * attn[b,c]
        #            = feat[b,d] * (attn @ masks)[b,d]
        mixed = jnp.dot(attn, masks_ref[...],
                        preferred_element_type=jnp.float32)          # (tb, Ep)
        out_ref[...] = feat * mixed


# ---------------------------------------------------------------------------
# Tiling helpers
# ---------------------------------------------------------------------------
def _round_up(x, m):
    return (x + m - 1) // m * m


def _pick_tb(B, C):
    """Divisor of B with sublane-legal blocks; prefer >=2 batch tiles (v7x)."""
    divs = [d for d in range(1, B + 1) if B % d == 0]

    def legal(d):
        img_ok = ((d * C) % 8 == 0) or (d == B)     # image block sublanes
        row_ok = (d % 8 == 0) or (d == B)           # cat/out block sublanes
        return img_ok and row_ok

    cands = [d for d in divs if legal(d)]
    if not cands:
        return B
    multi = [d for d in cands if B // d >= 2]       # keep both v7x TCs busy
    if multi:
        modest = [d for d in multi if d * C <= 512]
        return max(modest) if modest else min(multi)
    return min(cands)


def _pick_hw_tile(HWp, rows, bytes_per_elem, target_bytes=2 << 20):
    """Largest 128-multiple divisor of HWp keeping the streamed block within
    ~target_bytes (big DMAs to amortize per-grid-step overhead, no re-padding)."""
    max_cols = max(128, (target_bytes // max(rows * bytes_per_elem, 1)) // 128 * 128)
    if HWp <= max_cols:
        return HWp
    n = HWp // 128
    best = 1
    for d in range(1, n + 1):
        if n % d == 0 and d * 128 <= max_cols:
            best = d
    return best * 128


# ---------------------------------------------------------------------------
# Wrapper
# ---------------------------------------------------------------------------
@functools.partial(jax.jit, static_argnames=("stream_bf16",))
def conditional_simnet_forward(image, concat_categories, params, *,
                               stream_bf16=False):
    """image: (B, C, H, W) NCHW f32; concat_categories: (B, 2*num_cate) f32."""
    B, C, H, W = image.shape
    HW = H * W
    F = params["w_trunk"].shape[1]
    E = params["w_fc"].shape[1]
    NC = params["w_cate2"].shape[0]
    cat_dim = concat_categories.shape[1]

    img_dtype = jnp.bfloat16 if stream_bf16 else jnp.float32
    elem_bytes = 2 if stream_bf16 else 4

    # --- tiling (image streams; weights stay pinned in VMEM) ---
    tb = _pick_tb(B, C)
    tbC = tb * C
    HWp = _round_up(HW, 128)                     # pad HW only to lane multiple
    hw_tile = _pick_hw_tile(HWp, tbC, elem_bytes)
    Fp = _round_up(F, 128)                       # MXU/lane-dense trunk features
    Ep = _round_up(E, 128)                       # lane-dense embedding / output

    # --- lane/sublane-dense image layout: (B*C, HWp) ---
    img2d = image.reshape(B * C, HW).astype(img_dtype)
    if HWp != HW:
        img2d = jnp.pad(img2d, ((0, 0), (0, HWp - HW)))

    # --- pad feature dims to 128-multiples (zeros are exact no-ops) ---
    w_trunk = jnp.pad(params["w_trunk"], ((0, 0), (0, Fp - F)))
    b_trunk = jnp.pad(params["b_trunk"], ((0, 0), (0, Fp - F)))
    w_fc = jnp.pad(params["w_fc"], ((0, Fp - F), (0, Ep - E)))
    b_fc = jnp.pad(params["b_fc"], ((0, 0), (0, Ep - E)))
    masks = jnp.pad(params["masks"], ((0, 0), (0, Ep - E)))

    # constant selectors: fold (tb*C) row-sums into a (tb, C) pooled matrix
    # via matmuls instead of an in-kernel reshape / tiled trunk weight.
    rows = jnp.arange(tbC)
    sel = (rows[None, :] // C == jnp.arange(tb)[:, None]).astype(jnp.float32)   # (tb, tbC)
    fold = (rows[:, None] % C == jnp.arange(C)[None, :]).astype(jnp.float32)    # (tbC, C)

    grid = (B // tb, HWp // hw_tile)
    const = lambda i, j: (0, 0)

    weights = (sel, fold, w_trunk, b_trunk, w_fc, b_fc,
               params["w_cate1"], params["b_cate1"],
               params["w_cate2"], params["b_cate2"], masks)

    in_specs = [
        pl.BlockSpec((tbC, hw_tile), lambda i, j: (i, j)),     # image stream
        pl.BlockSpec((tb, cat_dim), lambda i, j: (i, 0)),      # categories
    ] + [pl.BlockSpec(w.shape, const) for w in weights]
    out_spec = pl.BlockSpec((tb, Ep), lambda i, j: (i, 0))

    # --- VMEM budget derived from the actual tiling (double-buffered stream) ---
    weight_bytes = 4 * sum(int(w.size) for w in weights)
    img_block_bytes = tbC * hw_tile * elem_bytes
    resident_bytes = (2 * img_block_bytes
                      + 2 * (weight_bytes + 4 * tb * Ep + 4 * tb * cat_dim)
                      + 4 * tbC * 128)                         # lane-padded acc
    vmem_limit = int(min(max(2 * resident_bytes, 16 << 20), 48 << 20))

    cost = pl.CostEstimate(
        flops=int(B * C * HWp
                  + 2 * B * (tbC * C + C * Fp + Fp * Ep + NC * Ep
                             + cat_dim * NC + NC * NC)),
        transcendentals=int(B * NC),
        bytes_accessed=int(elem_bytes * B * C * HWp
                           + 4 * (B * cat_dim + B * Ep)
                           + weight_bytes),
    )

    kernel = functools.partial(condsim_kernel, inv_hw=float(1.0 / HW))

    out_padded = pl.pallas_call(
        kernel,
        out_shape=jax.ShapeDtypeStruct((B, Ep), jnp.float32),
        grid_spec=pltpu.PrefetchScalarGridSpec(
            num_scalar_prefetch=0,
            grid=grid,
            in_specs=in_specs,
            out_specs=out_spec,
            scratch_shapes=[pltpu.VMEM((tbC, 1), jnp.float32)],
        ),
        compiler_params=pltpu.CompilerParams(
            dimension_semantics=("parallel", "arbitrary"),
            vmem_limit_bytes=vmem_limit,
        ),
        cost_estimate=cost,
    )(img2d, concat_categories, *weights)
    return out_padded[:, :E]


# ---------------------------------------------------------------------------
# Deterministic parameter construction (mirrors module __init__ shapes)
# ---------------------------------------------------------------------------
def make_params(key, *, C, trunk_features, embedding_size, num_conditions,
                num_category):
    ks = jax.random.split(key, 6)
    scale = 0.1
    params = {
        # backbone stand-in (conv trunk replacement) + replaced backbone.fc
        "w_trunk": scale * jax.random.normal(ks[0], (C, trunk_features), jnp.float32),
        "b_trunk": jnp.zeros((1, trunk_features), jnp.float32),
        "w_fc": scale * jax.random.normal(ks[1], (trunk_features, embedding_size), jnp.float32),
        "b_fc": scale * jax.random.normal(ks[2], (1, embedding_size), jnp.float32),
        # cate_net: Linear(2*num_cate -> NC), ReLU, Linear(NC -> NC), Softmax
        "w_cate1": scale * jax.random.normal(ks[3], (num_category * 2, num_conditions), jnp.float32),
        "b_cate1": jnp.zeros((1, num_conditions), jnp.float32),
        "w_cate2": scale * jax.random.normal(ks[4], (num_conditions, num_conditions), jnp.float32),
        "b_cate2": jnp.zeros((1, num_conditions), jnp.float32),
    }
    # masks: learnedmask=True, pre_mask=True branch — fill 0.1, disjoint blocks of 1
    mask_array = np.full((num_conditions, embedding_size), 0.1, dtype=np.float32)
    mask_len = embedding_size // num_conditions
    for i in range(num_conditions):
        mask_array[i, i * mask_len:(i + 1) * mask_len] = 1.0
    params["masks"] = jnp.asarray(mask_array)
    return params


# Pure-JAX reference for correctness check
def reference_forward(image, concat_categories, params):
    B, C, H, W = image.shape
    pooled = image.reshape(B, C, H * W).mean(axis=-1)
    trunk = jax.nn.relu(pooled @ params["w_trunk"] + params["b_trunk"])
    feat = trunk @ params["w_fc"] + params["b_fc"]                       # (B, E)
    h = jax.nn.relu(concat_categories @ params["w_cate1"] + params["b_cate1"])
    logits = h @ params["w_cate2"] + params["b_cate2"]
    attn = jax.nn.softmax(logits, axis=1)                                # (B, NC)
    embed_feature = params["masks"][None, :, :] * feat[:, None, :]
    weighted = embed_feature * attn[:, :, None]
    return jnp.sum(weighted, axis=1)


if __name__ == "__main__":
    # Small config consistent with the module
    B = 2
    C = 4
    H = W = 16
    num_category = 4
    num_conditions = 4
    embedding_size = 32
    trunk_features = 32   # stand-in for resnet fc.in_features

    key = jax.random.PRNGKey(0)
    k_img, k_cat, k_par = jax.random.split(key, 3)

    image = jax.random.normal(k_img, (B, C, H, W), jnp.float32)
    concat_categories = jax.random.normal(k_cat, (B, num_category * 2), jnp.float32)

    params = make_params(
        k_par,
        C=C,
        trunk_features=trunk_features,
        embedding_size=embedding_size,
        num_conditions=num_conditions,
        num_category=num_category,
    )

    out = conditional_simnet_forward(image, concat_categories, params)
    out = jax.block_until_ready(out)

    ref = reference_forward(image, concat_categories, params)
    np.testing.assert_allclose(np.asarray(out), np.asarray(ref), rtol=1e-4, atol=1e-4)

    print("KERNEL_OK")
</pallas_src>

<mosaic_0001>
module attributes {stable_mosaic.version = 11 : i64} {
  func.func @condsim_kernel(%arg0: i32, %arg1: i32, %arg2: memref<8x256xf32, #tpu.memory_space<vmem>>, %arg3: memref<2x8xf32, #tpu.memory_space<vmem>>, %arg4: memref<2x8xf32, #tpu.memory_space<vmem>>, %arg5: memref<8x4xf32, #tpu.memory_space<vmem>>, %arg6: memref<4x128xf32, #tpu.memory_space<vmem>>, %arg7: memref<1x128xf32, #tpu.memory_space<vmem>>, %arg8: memref<128x128xf32, #tpu.memory_space<vmem>>, %arg9: memref<1x128xf32, #tpu.memory_space<vmem>>, %arg10: memref<8x4xf32, #tpu.memory_space<vmem>>, %arg11: memref<1x4xf32, #tpu.memory_space<vmem>>, %arg12: memref<4x4xf32, #tpu.memory_space<vmem>>, %arg13: memref<1x4xf32, #tpu.memory_space<vmem>>, %arg14: memref<4x128xf32, #tpu.memory_space<vmem>>, %arg15: memref<2x128xf32, #tpu.memory_space<vmem>>, %arg16: memref<8x1xf32, #tpu.memory_space<vmem>>) attributes {dimension_semantics = [#tpu.dimension_semantics<parallel>, #tpu.dimension_semantics<arbitrary>], iteration_bounds = array<i64: 1, 1>, scalar_prefetch = 0 : i64, scratch_operands = 1 : i64, tpu.core_type = #tpu.core_type<tc>, window_params = [{transform_indices = @transform_0, window_bounds = array<i64: 8, 256>}, {transform_indices = @transform_1, window_bounds = array<i64: 2, 8>}, {pipeline_mode = #tpu.pipeline_mode<synchronous>, transform_indices = @transform_2, window_bounds = array<i64: 2, 8>}, {pipeline_mode = #tpu.pipeline_mode<synchronous>, transform_indices = @transform_3, window_bounds = array<i64: 8, 4>}, {pipeline_mode = #tpu.pipeline_mode<synchronous>, transform_indices = @transform_4, window_bounds = array<i64: 4, 128>}, {pipeline_mode = #tpu.pipeline_mode<synchronous>, transform_indices = @transform_5, window_bounds = array<i64: 1, 128>}, {pipeline_mode = #tpu.pipeline_mode<synchronous>, transform_indices = @transform_6, window_bounds = array<i64: 128, 128>}, {pipeline_mode = #tpu.pipeline_mode<synchronous>, transform_indices = @transform_7, window_bounds = array<i64: 1, 128>}, {pipeline_mode = #tpu.pipeline_mode<synchronous>, transform_indices = @transform_8, window_bounds = array<i64: 8, 4>}, {pipeline_mode = #tpu.pipeline_mode<synchronous>, transform_indices = @transform_9, window_bounds = array<i64: 1, 4>}, {pipeline_mode = #tpu.pipeline_mode<synchronous>, transform_indices = @transform_10, window_bounds = array<i64: 4, 4>}, {pipeline_mode = #tpu.pipeline_mode<synchronous>, transform_indices = @transform_11, window_bounds = array<i64: 1, 4>}, {pipeline_mode = #tpu.pipeline_mode<synchronous>, transform_indices = @transform_12, window_bounds = array<i64: 4, 128>}, {transform_indices = @transform_13, window_bounds = array<i64: 2, 128>}]} {
    %c0_i32 = arith.constant 0 : i32
    %0 = arith.cmpi eq, %arg1, %c0_i32 : i32
    %1 = arith.extui %0 : i1 to i32
    %c0_i32_0 = arith.constant 0 : i32
    %2 = arith.cmpi ne, %1, %c0_i32_0 : i32
    scf.if %2 {
      %cst_8 = arith.constant 0.000000e+00 : f32
      %12 = vector.broadcast %cst_8 : f32 to vector<8x1xf32>
      %c0_9 = arith.constant 0 : index
      %c0_10 = arith.constant 0 : index
      %13 = vector.load %arg16[%c0_9, %c0_10] : memref<8x1xf32, #tpu.memory_space<vmem>>, vector<8x1xf32>
      tpu.vector_store %arg16[%c0_9, %c0_10], %12 {strides = array<i32>} : memref<8x1xf32, #tpu.memory_space<vmem>>, vector<8x1xf32>,
    } else {
    }
    %c0 = arith.constant 0 : index
    %c0_1 = arith.constant 0 : index
    %3 = vector.load %arg16[%c0, %c0_1] : memref<8x1xf32, #tpu.memory_space<vmem>>, vector<8x1xf32>
    %c0_2 = arith.constant 0 : index
    %c0_3 = arith.constant 0 : index
    %4 = vector.load %arg2[%c0_2, %c0_3] : memref<8x256xf32, #tpu.memory_space<vmem>>, vector<8x256xf32>
    %cst = arith.constant dense<0.000000e+00> : vector<8xf32>
    %5 = vector.multi_reduction <add>, %4, %cst [1] : vector<8x256xf32> to vector<8xf32>
    %6 = vector.shape_cast %5 : vector<8xf32> to vector<8x1xf32>
    %7 = arith.addf %3, %6 : vector<8x1xf32>
    %c0_4 = arith.constant 0 : index
    %c0_5 = arith.constant 0 : index
    %8 = vector.load %arg16[%c0_4, %c0_5] : memref<8x1xf32, #tpu.memory_space<vmem>>, vector<8x1xf32>
    tpu.vector_store %arg16[%c0_4, %c0_5], %7 {strides = array<i32>} : memref<8x1xf32, #tpu.memory_space<vmem>>, vector<8x1xf32>,
    %c0_i32_6 = arith.constant 0 : i32
    %9 = arith.cmpi eq, %arg1, %c0_i32_6 : i32
    %10 = arith.extui %9 : i1 to i32
    %c0_i32_7 = arith.constant 0 : i32
    %11 = arith.cmpi ne, %10, %c0_i32_7 : i32
    scf.if %11 {
      %c0_8 = arith.constant 0 : index
      %c0_9 = arith.constant 0 : index
      %12 = vector.load %arg16[%c0_8, %c0_9] : memref<8x1xf32, #tpu.memory_space<vmem>>, vector<8x1xf32>
      %c0_10 = arith.constant 0 : index
      %c0_11 = arith.constant 0 : index
      %13 = vector.load %arg4[%c0_10, %c0_11] : memref<2x8xf32, #tpu.memory_space<vmem>>, vector<2x8xf32>
      %c0_12 = arith.constant 0 : index
      %c0_13 = arith.constant 0 : index
      %14 = vector.load %arg5[%c0_12, %c0_13] : memref<8x4xf32, #tpu.memory_space<vmem>>, vector<8x4xf32>
      %15 = vector.broadcast %12 : vector<8x1xf32> to vector<8x4xf32>
      %16 = arith.mulf %15, %14 : vector<8x4xf32>
      %cst_14 = arith.constant dense<0.000000e+00> : vector<2x4xf32>
      %17 = tpu.matmul %13, %16, %cst_14 {dimension_numbers = #tpu.dot_dimension_numbers<[1], [0], [0], [1], [0, 0, 1, 1], [], []>} : vector<2x8xf32>, vector<8x4xf32>, vector<2x4xf32> -> vector<2x4xf32>
      %cst_15 = arith.constant 3.906250e-03 : f32
      %18 = vector.broadcast %cst_15 : f32 to vector<2x4xf32>
      %19 = arith.mulf %17, %18 : vector<2x4xf32>
      %c0_16 = arith.constant 0 : index
      %c0_17 = arith.constant 0 : index
      %20 = vector.load %arg6[%c0_16, %c0_17] : memref<4x128xf32, #tpu.memory_space<vmem>>, vector<4x128xf32>
      %cst_18 = arith.constant dense<0.000000e+00> : vector<2x128xf32>
      %21 = tpu.matmul %19, %20, %cst_18 {dimension_numbers = #tpu.dot_dimension_numbers<[1], [0], [0], [1], [0, 0, 1, 1], [], []>} : vector<2x4xf32>, vector<4x128xf32>, vector<2x128xf32> -> vector<2x128xf32>
      %c0_19 = arith.constant 0 : index
      %c0_20 = arith.constant 0 : index
      %22 = vector.load %arg7[%c0_19, %c0_20] : memref<1x128xf32, #tpu.memory_space<vmem>>, vector<1x128xf32>
      %23 = vector.broadcast %22 : vector<1x128xf32> to vector<2x128xf32>
      %24 = arith.addf %21, %23 : vector<2x128xf32>
      %cst_21 = arith.constant 0.000000e+00 : f32
      %25 = vector.broadcast %cst_21 : f32 to vector<2x128xf32>
      %26 = arith.maximumf %24, %25 : vector<2x128xf32>
      %c0_22 = arith.constant 0 : index
      %c0_23 = arith.constant 0 : index
      %27 = vector.load %arg8[%c0_22, %c0_23] : memref<128x128xf32, #tpu.memory_space<vmem>>, vector<128x128xf32>
      %cst_24 = arith.constant dense<0.000000e+00> : vector<2x128xf32>
      %28 = tpu.matmul %26, %27, %cst_24 {dimension_numbers = #tpu.dot_dimension_numbers<[1], [0], [0], [1], [0, 0, 1, 1], [], []>} : vector<2x128xf32>, vector<128x128xf32>, vector<2x128xf32> -> vector<2x128xf32>
      %c0_25 = arith.constant 0 : index
      %c0_26 = arith.constant 0 : index
      %29 = vector.load %arg9[%c0_25, %c0_26] : memref<1x128xf32, #tpu.memory_space<vmem>>, vector<1x128xf32>
      %30 = vector.broadcast %29 : vector<1x128xf32> to vector<2x128xf32>
      %31 = arith.addf %28, %30 : vector<2x128xf32>
      %c0_27 = arith.constant 0 : index
      %c0_28 = arith.constant 0 : index
      %32 = vector.load %arg3[%c0_27, %c0_28] : memref<2x8xf32, #tpu.memory_space<vmem>>, vector<2x8xf32>
      %c0_29 = arith.constant 0 : index
      %c0_30 = arith.constant 0 : index
      %33 = vector.load %arg10[%c0_29, %c0_30] : memref<8x4xf32, #tpu.memory_space<vmem>>, vector<8x4xf32>
      %cst_31 = arith.constant dense<0.000000e+00> : vector<2x4xf32>
      %34 = tpu.matmul %32, %33, %cst_31 {dimension_numbers = #tpu.dot_dimension_numbers<[1], [0], [0], [1], [0, 0, 1, 1], [], []>} : vector<2x8xf32>, vector<8x4xf32>, vector<2x4xf32> -> vector<2x4xf32>
      %c0_32 = arith.constant 0 : index
      %c0_33 = arith.constant 0 : index
      %35 = vector.load %arg11[%c0_32, %c0_33] : memref<1x4xf32, #tpu.memory_space<vmem>>, vector<1x4xf32>
      %36 = vector.broadcast %35 : vector<1x4xf32> to vector<2x4xf32>
      %37 = arith.addf %34, %36 : vector<2x4xf32>
      %cst_34 = arith.constant 0.000000e+00 : f32
      %38 = vector.broadcast %cst_34 : f32 to vector<2x4xf32>
      %39 = arith.maximumf %37, %38 : vector<2x4xf32>
      %c0_35 = arith.constant 0 : index
      %c0_36 = arith.constant 0 : index
      %40 = vector.load %arg12[%c0_35, %c0_36] : memref<4x4xf32, #tpu.memory_space<vmem>>, vector<4x4xf32>
      %cst_37 = arith.constant dense<0.000000e+00> : vector<2x4xf32>
      %41 = tpu.matmul %39, %40, %cst_37 {dimension_numbers = #tpu.dot_dimension_numbers<[1], [0], [0], [1], [0, 0, 1, 1], [], []>} : vector<2x4xf32>, vector<4x4xf32>, vector<2x4xf32> -> vector<2x4xf32>
      %c0_38 = arith.constant 0 : index
      %c0_39 = arith.constant 0 : index
      %42 = vector.load %arg13[%c0_38, %c0_39] : memref<1x4xf32, #tpu.memory_space<vmem>>, vector<1x4xf32>
      %43 = vector.broadcast %42 : vector<1x4xf32> to vector<2x4xf32>
      %44 = arith.addf %41, %43 : vector<2x4xf32>
      %cst_40 = arith.constant dense<0xFF800000> : vector<2xf32>
      %45 = vector.multi_reduction <maximumf>, %44, %cst_40 [1] : vector<2x4xf32> to vector<2xf32>
      %46 = vector.shape_cast %45 : vector<2xf32> to vector<2x1xf32>
      %47 = vector.broadcast %46 : vector<2x1xf32> to vector<2x4xf32>
      %48 = arith.subf %44, %47 : vector<2x4xf32>
      %49 = math.exp %48 : vector<2x4xf32>
      %cst_41 = arith.constant dense<0.000000e+00> : vector<2xf32>
      %50 = vector.multi_reduction <add>, %49, %cst_41 [1] : vector<2x4xf32> to vector<2xf32>
      %51 = vector.shape_cast %50 : vector<2xf32> to vector<2x1xf32>
      %52 = vector.broadcast %51 : vector<2x1xf32> to vector<2x4xf32>
      %53 = arith.divf %49, %52 : vector<2x4xf32>
      %c0_42 = arith.constant 0 : index
      %c0_43 = arith.constant 0 : index
      %54 = vector.load %arg14[%c0_42, %c0_43] : memref<4x128xf32, #tpu.memory_space<vmem>>, vector<4x128xf32>
      %cst_44 = arith.constant dense<0.000000e+00> : vector<2x128xf32>
      %55 = tpu.matmul %53, %54, %cst_44 {dimension_numbers = #tpu.dot_dimension_numbers<[1], [0], [0], [1], [0, 0, 1, 1], [], []>} : vector<2x4xf32>, vector<4x128xf32>, vector<2x128xf32> -> vector<2x128xf32>
      %56 = arith.mulf %31, %55 : vector<2x128xf32>
      %c0_45 = arith.constant 0 : index
      %c0_46 = arith.constant 0 : index
      %57 = vector.load %arg15[%c0_45, %c0_46] : memref<2x128xf32, #tpu.memory_space<vmem>>, vector<2x128xf32>
      tpu.vector_store %arg15[%c0_45, %c0_46], %56 {strides = array<i32>} : memref<2x128xf32, #tpu.memory_space<vmem>>, vector<2x128xf32>,
    } else {
    }
    return
  }
  func.func @transform_0(%arg0: i32, %arg1: i32) -> (i32, i32) {
    %c0_i32 = arith.constant 0 : i32
    return %arg0, %arg1 : i32, i32
  }
  func.func @transform_1(%arg0: i32, %arg1: i32) -> (i32, i32) {
    %c0_i32 = arith.constant 0 : i32
    %c0_i32_0 = arith.constant 0 : i32
    return %arg0, %c0_i32 : i32, i32
  }
  func.func @transform_2(%arg0: i32, %arg1: i32) -> (i32, i32) {
    %c0_i32 = arith.constant 0 : i32
    %c0_i32_0 = arith.constant 0 : i32
    %c0_i32_1 = arith.constant 0 : i32
    return %c0_i32, %c0_i32_0 : i32, i32
  }
  func.func @transform_3(%arg0: i32, %arg1: i32) -> (i32, i32) {
    %c0_i32 = arith.constant 0 : i32
    %c0_i32_0 = arith.constant 0 : i32
    %c0_i32_1 = arith.constant 0 : i32
    return %c0_i32, %c0_i32_0 : i32, i32
  }
  func.func @transform_4(%arg0: i32, %arg1: i32) -> (i32, i32) {
    %c0_i32 = arith.constant 0 : i32
    %c0_i32_0 = arith.constant 0 : i32
    %c0_i32_1 = arith.constant 0 : i32
    return %c0_i32, %c0_i32_0 : i32, i32
  }
  func.func @transform_5(%arg0: i32, %arg1: i32) -> (i32, i32) {
    %c0_i32 = arith.constant 0 : i32
    %c0_i32_0 = arith.constant 0 : i32
    %c0_i32_1 = arith.constant 0 : i32
    return %c0_i32, %c0_i32_0 : i32, i32
  }
  func.func @transform_6(%arg0: i32, %arg1: i32) -> (i32, i32) {
    %c0_i32 = arith.constant 0 : i32
    %c0_i32_0 = arith.constant 0 : i32
    %c0_i32_1 = arith.constant 0 : i32
    return %c0_i32, %c0_i32_0 : i32, i32
  }
  func.func @transform_7(%arg0: i32, %arg1: i32) -> (i32, i32) {
    %c0_i32 = arith.constant 0 : i32
    %c0_i32_0 = arith.constant 0 : i32
    %c0_i32_1 = arith.constant 0 : i32
    return %c0_i32, %c0_i32_0 : i32, i32
  }
  func.func @transform_8(%arg0: i32, %arg1: i32) -> (i32, i32) {
    %c0_i32 = arith.constant 0 : i32
    %c0_i32_0 = arith.constant 0 : i32
    %c0_i32_1 = arith.constant 0 : i32
    return %c0_i32, %c0_i32_0 : i32, i32
  }
  func.func @transform_9(%arg0: i32, %arg1: i32) -> (i32, i32) {
    %c0_i32 = arith.constant 0 : i32
    %c0_i32_0 = arith.constant 0 : i32
    %c0_i32_1 = arith.constant 0 : i32
    return %c0_i32, %c0_i32_0 : i32, i32
  }
  func.func @transform_10(%arg0: i32, %arg1: i32) -> (i32, i32) {
    %c0_i32 = arith.constant 0 : i32
    %c0_i32_0 = arith.constant 0 : i32
    %c0_i32_1 = arith.constant 0 : i32
    return %c0_i32, %c0_i32_0 : i32, i32
  }
  func.func @transform_11(%arg0: i32, %arg1: i32) -> (i32, i32) {
    %c0_i32 = arith.constant 0 : i32
    %c0_i32_0 = arith.constant 0 : i32
    %c0_i32_1 = arith.constant 0 : i32
    return %c0_i32, %c0_i32_0 : i32, i32
  }
  func.func @transform_12(%arg0: i32, %arg1: i32) -> (i32, i32) {
    %c0_i32 = arith.constant 0 : i32
    %c0_i32_0 = arith.constant 0 : i32
    %c0_i32_1 = arith.constant 0 : i32
    return %c0_i32, %c0_i32_0 : i32, i32
  }
  func.func @transform_13(%arg0: i32, %arg1: i32) -> (i32, i32) {
    %c0_i32 = arith.constant 0 : i32
    %c0_i32_0 = arith.constant 0 : i32
    return %arg0, %c0_i32 : i32, i32
  }
}

</mosaic_0001>

<bundles_post_ra>
// kernel: conditional_simnet_forward.1
= control target key start
LH: loop header
LB: loop body
LE: loop exit
PB: predicated region body
PF: predicated region fallthrough
CT: control target
= control target key end

     0   :  { %s956_s0 = inlined_call_operand.vmem [shape: f32[8,256], index: 0, kind: input, shape index: {}]   ;;  %s957_s1 = inlined_call_operand.vmem [shape: f32[2,8], index: 1, kind: input, shape index: {}]   ;;  %s958_s2 = inlined_call_operand.vmem [shape: f32[2,8], index: 2, kind: input, shape index: {}]   ;;  %s959_s3 = inlined_call_operand.vmem [shape: f32[8,4], index: 3, kind: input, shape index: {}]   ;;  %s960_s4 = inlined_call_operand.vmem [shape: f32[4,128], index: 4, kind: input, shape index: {}]   ;;  %s961_s5 = inlined_call_operand.vmem [shape: f32[1,128], index: 5, kind: input, shape index: {}]   ;;  %s962_s6 = inlined_call_operand.vmem [shape: f32[128,128], index: 6, kind: input, shape index: {}]   ;;  %s963_s7 = inlined_call_operand.vmem [shape: f32[1,128], index: 7, kind: input, shape index: {}]   ;;  %s964_s8 = inlined_call_operand.vmem [shape: f32[8,4], index: 8, kind: input, shape index: {}]   ;;  %s965_s9 = inlined_call_operand.vmem [shape: f32[1,4], index: 9, kind: input, shape index: {}]   ;;  %s966_s10 = inlined_call_operand.vmem [shape: f32[4,4], index: 10, kind: input, shape index: {}]   ;;  %s967_s11 = inlined_call_operand.vmem [shape: f32[1,4], index: 11, kind: input, shape index: {}]   ;;  %s968_s12 = inlined_call_operand.vmem [shape: f32[4,128], index: 12, kind: input, shape index: {}]   ;;  %s969_s13 = inlined_call_operand.hbm [shape: f32[2,128], index: 13, kind: output, shape index: {}]  }
   0x1   :  { %v52_v0 = vld [vmem:[%s956_s0] sm:$0xff]  ;;  %v53_v1 = vld [vmem:[%s956_s0 + $0x8] sm:$0xff] }
   0x2   :  { %18 = vsyncpa [#allocation4], 0  ;;  %v54_v2 = vadd.f32 %v53_v1, %v52_v0  ;;  %vm49_vm0 = vcmask 7168   ;;  %v756_v3 = vmov 0.0   ;;  %v757_v4 = vmov 0   ;;  %v65_v9 = vld [vmem:[%s959_s3] sm:$0xff] }
   0x3   :  { %50 = vst.msk [vmem:[#allocation2] sm:$0xff] %vm49_vm0, %v756_v3  ;;  %638 = vmatprep.subr.mxu1 %v756_v3  ;;  %727 = vset.pattern.permute.xlu0 %v757_v4  ;;  %vm758_vm1 = vmmov 0   ;;  %v64_v12 = vld [vmem:[%s958_s2] sm:$0x3]  ;;  %vm72_vm2 = vcmask 64512   ;;  %vm159_vm3 = vcmask 1043456  }
   0x4   :  { %55 = vadd.xlane.f32.xlu0 %v54_v2  ;;  %640 = vmatprep.mubr.msk.f32.mxu1 %vm758_vm1, %v756_v3  ;;  %v147_v13 = vld [vmem:[%s960_s4] sm:$0xf]  ;;  %v235_v15 = vld [vmem:[%s962_s6 + $0x8] sm:$0xff]  ;;  %v236_v16 = vld [vmem:[%s962_s6 + $0x10] sm:$0xff]  ;;  %v759_v17 = vmov 0.0|0.0   ;;  %vm155_vm4 = vcmask 31744  }
   0x5   :  { %680 = vmatprep.mubr.msk.f32.mxu0 %vm758_vm1, %v756_v3  ;;  %v234_v14 = vld [vmem:[%s962_s6] sm:$0xff]  ;;  %698 = vmatprep.subr.bf16.mxu0 %v759_v17  ;;  %v237_v19 = vld [vmem:[%s962_s6 + $0x18] sm:$0xff]  ;;  %v239_v22 = vld [vmem:[%s962_s6 + $0x28] sm:$0xff]  ;;  %vm494_vm5 = vcmask 25600   ;;  %s760_s16 = smov [#allocation3]  }
   0x6   :  { %v699_v18 = vpack.c.bf16 %v235_v15, %v234_v14  ;;  %v702_v20 = vpack.c.bf16 %v237_v19, %v236_v16  ;;  %v238_v21 = vld [vmem:[%s962_s6 + $0x20] sm:$0xff]  ;;  %v240_v24 = vld [vmem:[%s962_s6 + $0x30] sm:$0xff]  ;;  %v241_v25 = vld [vmem:[%s962_s6 + $0x38] sm:$0xff]  ;;  %s591_s3 = sshll.u32 %s760_s16, 4  ;;  %s592_s3 = int_to_ptr.vmem [resolvable:$true] %s591_s3 }
   0x7   :  { %v705_v23 = vpack.c.bf16 %v239_v22, %v238_v21  ;;  %v708_v26 = vpack.c.bf16 %v241_v25, %v240_v24  ;;  %v242_v27 = vld [vmem:[%s962_s6 + $0x40] sm:$0xff]  ;;  %v243_v28 = vld [vmem:[%s962_s6 + $0x48] sm:$0xff]  ;;  %v244_v30 = vld [vmem:[%s962_s6 + $0x50] sm:$0xff]  ;;  %p737_p1 = scmp.lt.s32.totalorder %s592_s3, %s592_s3 }
   0x8   :  { %700 = vmatpush3.bf16.msra.mxu0 %v699_v18  ;;  %v711_v29 = vpack.c.bf16 %v243_v28, %v242_v27  ;;  %v245_v31 = vld [vmem:[%s962_s6 + $0x58] sm:$0xff]  ;;  %v246_v33 = vld [vmem:[%s962_s6 + $0x60] sm:$0xff]  ;;  %v247_v34 = vld [vmem:[%s962_s6 + $0x68] sm:$0xff] }
   0x9   :  { %701 = vmatprep.subr.bf16.mxu0 %v759_v17  ;;  %v714_v32 = vpack.c.bf16 %v245_v31, %v244_v30  ;;  %v717_v35 = vpack.c.bf16 %v247_v34, %v246_v33  ;;  %v328_v39 = vld [vmem:[%s964_s8] sm:$0xff]  ;;  %v248_v41 = vld [vmem:[%s962_s6 + $0x70] sm:$0xff]  ;;  %v249_v42 = vld [vmem:[%s962_s6 + $0x78] sm:$0xff] }
   0xa   :  { %v51_v5 = vld [vmem:[#allocation2] sm:$0xff]  ;;  %v720_v43 = vpack.c.bf16 %v249_v42, %v248_v41 }
   0xb   :  { %v327_v40 = vld [vmem:[%s957_s1] sm:$0x3] }
   0xc   :  { %703 = vmatpush3.bf16.msra.mxu0 %v702_v20  ;;  %v410_v44 = vld [vmem:[%s966_s10] sm:$0xf] }
   0xd   :  { %704 = vmatprep.subr.bf16.mxu0 %v759_v17  ;;  %v600_v45 = vld [vmem:[%s961_s5] ss:$0 sm:$0xff] }
   0xe   :  { %v604_v49 = vld [vmem:[%s965_s9] ss:$0 sm:$0xff] }
   0xf   :  { %v606_v57 = vld [vmem:[%s967_s11] ss:$0 sm:$0xff] }
  0x10   :  { %706 = vmatpush3.bf16.msra.mxu0 %v705_v23 }
  0x11   :  { %707 = vmatprep.subr.bf16.mxu0 %v759_v17 }
  0x14   :  { %709 = vmatpush3.bf16.msra.mxu0 %v708_v26 }
  0x15   :  { %710 = vmatprep.subr.bf16.mxu0 %v759_v17 }
  0x18   :  { %712 = vmatpush3.bf16.msra.mxu0 %v711_v29 }
  0x19   :  { %713 = vmatprep.subr.bf16.mxu0 %v759_v17 }
  0x1c   :  { %715 = vmatpush3.bf16.msra.mxu0 %v714_v32 }
  0x1d   :  { %716 = vmatprep.subr.bf16.mxu0 %v759_v17 }
  0x20   :  { %718 = vmatpush3.bf16.msra.mxu0 %v717_v35 }
  0x21   :  { %719 = vmatprep.subr.bf16.mxu0 %v759_v17 }
  0x24   :  { %721 = vmatpush3.bf16.msra.mxu0 %v720_v43 }
  0x91   :  { %v56_v6 = vpop.xlane.xlu0 %55 }
  0x92   :  { %v57_v7 = vadd.f32 %v56_v6, %v51_v5 }
  0x94   :  { %59 = vst.msk [vmem:[#allocation2] sm:$0xff] %vm49_vm0, %v57_v7  ;;  %v603_v7 = vld [vmem:[%s963_s7] ss:$0 sm:$0xff] }
  0x9b   :  { %v63_v8 = vld [vmem:[#allocation2] sm:$0xff] }
  0x9c   :  { %68 = vperm.xlu0 %727, %v63_v8  }
 0x11b   :  { %v69_v10 = vpop.permute.xlu0 %68 }
 0x11c   :  { %v71_v11 = vmul.f32 %v69_v10, %v65_v9 }
 0x11e   :  { %639 = vmatpush3.msra.mxu1 %v71_v11 }
 0x11f   :  { %641 = vmatmul.mubr.msk.f32.vlgmr.msra.gmra.mrb[0].mxu1 %vm72_vm2, %v64_v12  ;;  %643 = vmatprep.subr.mxu1 %v756_v3 }
 0x120   :  { %644 = vmatpush3.msk.msra.mxu1 %vm159_vm3, %v147_v13  ;;  %645 = vmatprep.mubr.msk.f32.mxu1 %vm758_vm1, %v756_v3 }
 0x121   :  { %683 = vmatprep.subr.mxu1 %v756_v3 }
 0x1f2   :  { %v142_v36 = vpop.f32.mrb[0].mxu1 }
 0x1f3   :  { %v146_v37 = vmul.f32 0.00390625, %v142_v36  ;;  %v642_v38 = vpop.f32.mrb[1].mxu1 }
 0x1f5   :  { %646 = vmatmul.mubr.msk.f32.vlgmr.msra.gmra.mrb[2].mxu1 %vm155_vm4, %v146_v37 }
 0x1f6   :  { %684 = vmatpush3.msra.mxu1 %v328_v39  ;;  %685 = vmatprep.mubr.msk.f32.mxu1 %vm758_vm1, %v756_v3 }
 0x1f7   :  { %688 = vmatprep.subr.mxu1 %v756_v3 }
 0x1f9   :  { %686 = vmatmul.mubr.msk.f32.vlgmr.msra.gmra.mrb[4].mxu1 %vm72_vm2, %v327_v40 }
 0x1fa   :  { %690 = vmatprep.mubr.msk.f32.mxu1 %vm758_vm1, %v756_v3  ;;  %689 = vmatpush3.msk.msra.mxu1 %vm159_vm3, %v410_v44 }
 0x1fb   :  { %693 = vmatprep.subr.mxu1 %v756_v3 }
 0x2c8   :  { %v229_v46 = vpop.f32.mrb[2].mxu1 }
 0x2c9   :  { %v230_v47 = vadd.f32 %v600_v45, %v229_v46  ;;  %v647_v48 = vpop.f32.mrb[3].mxu1 }
 0x2cb   :  { %v233_v50 = vmax.f32 %v230_v47, 0.0 }
 0x2cc   :  { %v405_v51 = vpop.f32.mrb[4].mxu1 }
 0x2cd   :  { %v406_v52 = vadd.f32 %v604_v49, %v405_v51  ;;  %681 = vmatmul.mubr.f32.vlgmr.msra.gmra.mrb[0].mxu0 %v233_v50  ;;  %v687_v53 = vpop.f32.mrb[5].mxu1 }
 0x2cf   :  { %v409_v54 = vmax.f32 %v406_v52, 0.0 }
 0x2d1   :  { %691 = vmatmul.mubr.msk.f32.vlgmr.msra.gmra.mrb[6].mxu1 %vm155_vm4, %v409_v54 }
 0x2d2   :  { %695 = vmatprep.mubr.msk.f32.mxu1 %vm758_vm1, %v756_v3  ;;  %v506_v3 = vld [vmem:[%s968_s12] sm:$0xf]  ;;  %s732_s12 = scalar_lea.vmem %s592_s3, 32 }
 0x2d3   :  { %694 = vmatpush3.msk.msra.mxu1 %vm159_vm3, %v506_v3  ;;  %p733_p0 = scmp.ne.s32.totalorder %s592_s3, %s732_s12  ;;  %p738_p2 = scmp.lt.s32.totalorder %s732_s12, %s732_s12 }
 0x2d5   :  { %p739_p3 = por %p738_p2, %p737_p1 }
 0x2d7   :  { %p740_p4 = pnand %p739_p3, %p733_p0 }
 0x3a0   :  { %v323_v55 = vpop.f32.mrb[0].mxu0 }
 0x3a1   :  { %v682_v56 = vpop.f32.mrb[1].mxu0  ;;  %v324_v8 = vadd.f32 %v603_v7, %v323_v55 }
 0x3a4   :  { %v490_v58 = vpop.f32.mrb[6].mxu1 }
 0x3a5   :  { %v491_v59 = vadd.f32 %v606_v57, %v490_v58  ;;  %v692_v60 = vpop.f32.mrb[7].mxu1 }
 0x3a7   :  { %v495_v61 = vsel %vm494_vm5, %v491_v59, -inf }
 0x3a8   :  { %496 = vmax.xlane.f32.xlu1 %v495_v61 }
 0x435   :  { %v497_v62 = vpop.xlane.xlu1 %496 }
 0x436   :  { %v498_v63 = vsub.f32 %v491_v59, %v497_v62 }
 0x438   :  { %v499_v0 = vmul.f32 1.442695, %v498_v63 }
 0x43a   :  { %728 = vpow2.f32 %v499_v0 }
 0x444   :  { %v729_v1 = vpop.eup %728 }
 0x445   :  { %v501_v2 = vsel %vm494_vm5, %v729_v1, 0.0 }
 0x446   :  { %502 = vadd.xlane.f32.xlu1 %v501_v2 }
 0x4d3   :  { %v503_v4 = vpop.xlane.xlu1 %502 }
 0x4d4   :  { %730 = vrcp.f32 %v503_v4 }
 0x4de   :  { %v731_v5 = vpop.eup %730 }
 0x4df   :  { %v505_v6 = vmul.f32 %v731_v5, %v729_v1 }
 0x4e1   :  { %696 = vmatmul.mubr.msk.f32.vlgmr.msra.gmra.mrb[8].mxu1 %vm155_vm4, %v505_v6 }
 0x5b4   :  { %v579_v9 = vpop.f32.mrb[8].mxu1 }
 0x5b5   :  { %v583_v10 = vmul.f32 %v579_v9, %v324_v8  ;;  %v697_v11 = vpop.f32.mrb[9].mxu1 }
 0x5b7   :  { %584 = vst [vmem:[#allocation3] sm:$0x3] %v583_v10 }
 0x5b8   :  { %743 = shalt.err (!%p740_p4)
}
 0x5b9   :  { %s744_s18 = scalar_lea.hbm %s969_s13, 32 }
 0x5ba   :  { %p745_p5 = scmp.ne.s32.totalorder %s969_s13, %s744_s18  ;;  %p748_p6 = scmp.lt.u32.totalorder %s744_s18, %s969_s13 }
 0x5bc   :  { %p750_p7 = pnand %p748_p6, %p745_p5 }
 0x5be   :  { %753 = shalt.err (!%p750_p7)
}
 0x5bf   :  { %594 = dma.vmem_to_hbm [thread:$0]  %s592_s3, 32, %s969_s13, [#allocation4]  }
 0x5c0   :  { %754 = dma.done.wait [#allocation4], 32  }
 0x5c1   :  { %755 = vsyncadd [#allocation4], 4294967264 }
 0x5c2   :  { %598 = vsyncpa [#allocation4], 1 }

</bundles_post_ra>
